<compile_context>
chip_gen: v6e
topology: v6e:2x2x1
jax: 0.10.0
libtpu: 0.0.40
codegen_flags: <defaults>
</compile_context>

<pallas_src>
import numpy as np
import jax
import jax.numpy as jnp
from jax.experimental import pallas as pl
from jax.experimental.pallas import tpu as pltpu

INFINITY_NUMBER = 1e12  # constant.INFINITY_NUMBER

# ---- sizes ----
B, L = 2, 8
VOCAB, EMB_DIM, POS_DIM, NER_DIM = 50, 32, 8, 8
N_POS, N_NER = 10, 7
HIDDEN = 32                      # opt['hidden_dim'] == mem_dim
NUM_GCN_LAYERS = 2               # kernel below is written for exactly 2 layers
MLP_LAYERS = 2
NUM_CLASS = 5
IN_DIM = EMB_DIM + POS_DIM + NER_DIM   # 48
LOGIT_PAD = 128                  # lane-dense classifier output; sliced to NUM_CLASS outside


# ---------------------------------------------------------------------------
# Fused kernel: per-example GCN layers + masked max pooling + out_mlp + classifier
# Single grid-less invocation; pooled features live in a VMEM scratch only.
# ---------------------------------------------------------------------------
def cgcn_fused_kernel(adj_ref, x_ref, subjm_ref, objm_ref,
                      w0_ref, b0_ref, w1_ref, b1_ref,
                      wm1_ref, bm1_ref, wm2_ref, bm2_ref,
                      wc_ref, bc_ref,
                      logits_ref, hout_ref, feat_sc):
    w0 = w0_ref[...]
    b0 = b0_ref[...]
    w1 = w1_ref[...]
    b1 = b1_ref[...]

    # Static unroll over the (tiny) batch: per-example GCN + masked max pooling.
    for b in range(B):
        adj = adj_ref[b]                                   # (L, L) f32
        x = x_ref[b]                                       # (L, IN_DIM) f32

        row_sum = jnp.sum(adj, axis=1, keepdims=True)      # adj.sum(2) -> (L, 1)
        col_sum = jnp.sum(adj, axis=0)[:, None]            # adj.sum(1) -> (L, 1), no transpose
        denom = row_sum + 1.0
        pool_mask = (row_sum + col_sum) == 0.0             # (L, 1) bool

        # GCN layer 0: relu(((A x + x) W0 + 2 b0) / denom)  [== W0(Ax)+b0 + W0(x)+b0]
        ax = jnp.dot(adj, x, preferred_element_type=jnp.float32)
        h = jnp.maximum(
            (jnp.dot(ax + x, w0, preferred_element_type=jnp.float32) + 2.0 * b0) / denom,
            0.0)
        # (gcn dropout between layers is identity in eval mode)

        # GCN layer 1
        ah = jnp.dot(adj, h, preferred_element_type=jnp.float32)
        h = jnp.maximum(
            (jnp.dot(ah + h, w1, preferred_element_type=jnp.float32) + 2.0 * b1) / denom,
            0.0)                                           # (L, HIDDEN)

        subj_mask = subjm_ref[b] > 0.5                     # (L, 1) bool (True = mask out)
        obj_mask = objm_ref[b] > 0.5

        # pool_type == 'max': masked_fill(-INF) then max over the token axis
        h_out = jnp.max(jnp.where(pool_mask, -INFINITY_NUMBER, h), axis=0, keepdims=True)
        s_out = jnp.max(jnp.where(subj_mask, -INFINITY_NUMBER, h), axis=0, keepdims=True)
        o_out = jnp.max(jnp.where(obj_mask, -INFINITY_NUMBER, h), axis=0, keepdims=True)

        hout_ref[b:b + 1, :] = h_out                       # second return value of forward()
        feat_sc[b:b + 1, 0:HIDDEN] = h_out                 # cat([h_out, subj, obj], dim=1)
        feat_sc[b:b + 1, HIDDEN:2 * HIDDEN] = s_out
        feat_sc[b:b + 1, 2 * HIDDEN:3 * HIDDEN] = o_out

    # out_mlp (Linear+ReLU x 2) + classifier on the whole batch, all in VMEM.
    feat = feat_sc[...]                                    # (B, 3*HIDDEN)
    m = jnp.maximum(
        jnp.dot(feat, wm1_ref[...], preferred_element_type=jnp.float32) + bm1_ref[...], 0.0)
    m = jnp.maximum(
        jnp.dot(m, wm2_ref[...], preferred_element_type=jnp.float32) + bm2_ref[...], 0.0)
    logits_ref[...] = (
        jnp.dot(m, wc_ref[...], preferred_element_type=jnp.float32) + bc_ref[...])


def run_cgcn_fused(adj, x, subj_mask, obj_mask,
                   w0, b0, w1, b1, wm1, bm1, wm2, bm2, wc_pad, bc_pad):
    vmem = lambda: pl.BlockSpec(memory_space=pltpu.MemorySpace.VMEM)
    return pl.pallas_call(
        cgcn_fused_kernel,
        out_shape=(jax.ShapeDtypeStruct((B, LOGIT_PAD), jnp.float32),   # padded logits
                   jax.ShapeDtypeStruct((B, HIDDEN), jnp.float32)),     # h_out
        in_specs=[vmem() for _ in range(14)],
        out_specs=(vmem(), vmem()),
        scratch_shapes=[pltpu.VMEM((B, 3 * HIDDEN), jnp.float32)],      # pooled features
    )(adj, x, subj_mask, obj_mask, w0, b0, w1, b1, wm1, bm1, wm2, bm2, wc_pad, bc_pad)


# ---------------------------------------------------------------------------
# Jitted glue: embedding gathers, masks, classifier-weight padding, kernel call.
# ---------------------------------------------------------------------------
@jax.jit
def _forward_core(adj, words, pos, ner, subj_pos, obj_pos, params):
    (emb_w, pos_w, ner_w, w_g0, b_g0, w_g1, b_g1,
     w_m1, b_m1, w_m2, b_m2, w_c, b_c) = params

    word_embs = jnp.take(emb_w, words, axis=0)
    embs = jnp.concatenate(
        [word_embs, jnp.take(pos_w, pos, axis=0), jnp.take(ner_w, ner, axis=0)],
        axis=2).astype(jnp.float32)                          # (B, L, IN_DIM)
    # in_drop / rnn_drop: eval mode -> identity; opt['rnn'] = False.

    subj_mask = (subj_pos != 0).astype(jnp.float32)[..., None]   # (B, L, 1)
    obj_mask = (obj_pos != 0).astype(jnp.float32)[..., None]

    # Lane-dense classifier output: zero-pad to 128 lanes, slice back after the kernel.
    wc_pad = jnp.zeros((HIDDEN, LOGIT_PAD), jnp.float32).at[:, :NUM_CLASS].set(w_c)
    bc_pad = jnp.zeros((1, LOGIT_PAD), jnp.float32).at[:, :NUM_CLASS].set(b_c)

    logits_pad, h_out = run_cgcn_fused(
        adj, embs, subj_mask, obj_mask,
        w_g0, b_g0, w_g1, b_g1, w_m1, b_m1, w_m2, b_m2, wc_pad, bc_pad)
    return logits_pad[:, :NUM_CLASS], h_out


# ---------------------------------------------------------------------------
# Host-side: adjacency from dependency heads (prune_k = -1: full tree,
# undirected, no self-loop — matches tree_to_adj for the unpruned tree).
# TODO(synk): prune_k >= 0 path-pruning (head_to_tree) is host-side recursion
#             with no clean Pallas equivalent; prune_k=-1 is implemented here.
# ---------------------------------------------------------------------------
def build_adj(head_np, seq_len_np, maxlen):
    adj = np.zeros((head_np.shape[0], maxlen, maxlen), dtype=np.float32)
    for b in range(head_np.shape[0]):
        for i in range(int(seq_len_np[b])):
            h = int(head_np[b, i])
            if h > 0:
                adj[b, i, h - 1] = 1.0
                adj[b, h - 1, i] = 1.0
    return adj


def cgcn_forward(inputs, params):
    words, masks, pos, ner, deprel, head, subj_pos, obj_pos, subj_type, obj_type = inputs

    seq_length = (np.asarray(masks) == 0).astype(np.int64).sum(1)
    maxlen = int(max(seq_length))
    assert maxlen == L  # batcher pads to batch max length

    adj = jnp.asarray(build_adj(np.asarray(head), seq_length, maxlen))
    return _forward_core(adj, words, pos, ner, subj_pos, obj_pos, params)


def make_params(key):
    ks = jax.random.split(key, 9)
    emb_w = jax.random.uniform(ks[0], (VOCAB, EMB_DIM), jnp.float32)   # uniform_ on rows 1:
    emb_w = emb_w.at[0].set(0.0)                                       # padding_idx = PAD_ID = 0
    pos_w = jax.random.normal(ks[1], (N_POS, POS_DIM), jnp.float32)
    ner_w = jax.random.normal(ks[2], (N_NER, NER_DIM), jnp.float32)

    def linear(k, fan_in, fan_out):
        kw, kb = jax.random.split(k)
        bound = 1.0 / np.sqrt(fan_in)
        w = jax.random.uniform(kw, (fan_in, fan_out), jnp.float32, -bound, bound)
        b = jax.random.uniform(kb, (1, fan_out), jnp.float32, -bound, bound)
        return w, b

    w_g0, b_g0 = linear(ks[3], IN_DIM, HIDDEN)      # GCN layer 0
    w_g1, b_g1 = linear(ks[4], HIDDEN, HIDDEN)      # GCN layer 1
    w_m1, b_m1 = linear(ks[5], 3 * HIDDEN, HIDDEN)  # out_mlp[0]
    w_m2, b_m2 = linear(ks[6], HIDDEN, HIDDEN)      # out_mlp[2]
    w_c, b_c = linear(ks[7], HIDDEN, NUM_CLASS)     # classifier
    # NOTE: self.input_W_G is defined in __init__ but unused in forward -> omitted.
    return (emb_w, pos_w, ner_w, w_g0, b_g0, w_g1, b_g1, w_m1, b_m1, w_m2, b_m2, w_c, b_c)


def make_inputs(key):
    seq_len = np.array([L, 6], dtype=np.int64)
    masks = np.ones((B, L), dtype=np.int32)
    for b in range(B):
        masks[b, :seq_len[b]] = 0

    k1, k2, k3 = jax.random.split(key, 3)
    # np.array(...) makes writable copies (np.asarray of a jax array is read-only).
    words = np.array(jax.random.randint(k1, (B, L), 1, VOCAB, dtype=jnp.int32))
    pos = np.array(jax.random.randint(k2, (B, L), 0, N_POS, dtype=jnp.int32))
    ner = np.array(jax.random.randint(k3, (B, L), 0, N_NER, dtype=jnp.int32))
    for b in range(B):
        words[b, seq_len[b]:] = 0   # PAD

    # chain dependency tree: token i's head is token i-1 (1-indexed), token 0 is root
    head = np.zeros((B, L), dtype=np.int32)
    for b in range(B):
        for i in range(1, seq_len[b]):
            head[b, i] = i

    def rel_pos(start, end, length):
        p = np.zeros(L, dtype=np.int32)
        for i in range(length):
            p[i] = (i - start) if i < start else ((i - end) if i > end else 0)
        p[length:] = L   # padded positions: nonzero -> masked out
        return p

    subj_pos = np.stack([rel_pos(1, 2, seq_len[0]), rel_pos(0, 1, seq_len[1])])
    obj_pos = np.stack([rel_pos(4, 5, seq_len[0]), rel_pos(3, 4, seq_len[1])])
    deprel = np.zeros((B, L), dtype=np.int32)
    subj_type = np.zeros((B,), dtype=np.int32)
    obj_type = np.zeros((B,), dtype=np.int32)

    return (jnp.asarray(words), jnp.asarray(masks), jnp.asarray(pos), jnp.asarray(ner),
            jnp.asarray(deprel), jnp.asarray(head), jnp.asarray(subj_pos),
            jnp.asarray(obj_pos), jnp.asarray(subj_type), jnp.asarray(obj_type))


if __name__ == "__main__":
    root = jax.random.PRNGKey(0)
    k_params, k_inputs = jax.random.split(root)
    params = make_params(k_params)
    inputs = make_inputs(k_inputs)

    logits, h_out = cgcn_forward(inputs, params)
    jax.block_until_ready((logits, h_out))
    assert logits.shape == (B, NUM_CLASS) and h_out.shape == (B, HIDDEN)
    assert bool(jnp.all(jnp.isfinite(logits))) and bool(jnp.all(jnp.isfinite(h_out)))
    print("KERNEL_OK")
</pallas_src>

<mosaic_0001>
module attributes {stable_mosaic.version = 11 : i64} {
  func.func @cgcn_fused_kernel(%arg0: memref<2x8x8xf32, #tpu.memory_space<vmem>>, %arg1: memref<2x8x48xf32, #tpu.memory_space<vmem>>, %arg2: memref<2x8x1xf32, #tpu.memory_space<vmem>>, %arg3: memref<2x8x1xf32, #tpu.memory_space<vmem>>, %arg4: memref<48x32xf32, #tpu.memory_space<vmem>>, %arg5: memref<1x32xf32, #tpu.memory_space<vmem>>, %arg6: memref<32x32xf32, #tpu.memory_space<vmem>>, %arg7: memref<1x32xf32, #tpu.memory_space<vmem>>, %arg8: memref<96x32xf32, #tpu.memory_space<vmem>>, %arg9: memref<1x32xf32, #tpu.memory_space<vmem>>, %arg10: memref<32x32xf32, #tpu.memory_space<vmem>>, %arg11: memref<1x32xf32, #tpu.memory_space<vmem>>, %arg12: memref<32x128xf32, #tpu.memory_space<vmem>>, %arg13: memref<1x128xf32, #tpu.memory_space<vmem>>, %arg14: memref<2x128xf32, #tpu.memory_space<vmem>>, %arg15: memref<2x32xf32, #tpu.memory_space<vmem>>, %arg16: memref<2x96xf32, #tpu.memory_space<vmem>>) attributes {dimension_semantics = [], scalar_prefetch = 0 : i64, scratch_operands = 1 : i64, tpu.core_type = #tpu.core_type<tc>} {
    %c0 = arith.constant 0 : index
    %c0_0 = arith.constant 0 : index
    %0 = vector.load %arg4[%c0, %c0_0] : memref<48x32xf32, #tpu.memory_space<vmem>>, vector<48x32xf32>
    %c0_1 = arith.constant 0 : index
    %c0_2 = arith.constant 0 : index
    %1 = vector.load %arg5[%c0_1, %c0_2] : memref<1x32xf32, #tpu.memory_space<vmem>>, vector<1x32xf32>
    %c0_3 = arith.constant 0 : index
    %c0_4 = arith.constant 0 : index
    %2 = vector.load %arg6[%c0_3, %c0_4] : memref<32x32xf32, #tpu.memory_space<vmem>>, vector<32x32xf32>
    %c0_5 = arith.constant 0 : index
    %c0_6 = arith.constant 0 : index
    %3 = vector.load %arg7[%c0_5, %c0_6] : memref<1x32xf32, #tpu.memory_space<vmem>>, vector<1x32xf32>
    %c0_7 = arith.constant 0 : index
    %c0_8 = arith.constant 0 : index
    %c0_9 = arith.constant 0 : index
    %4 = vector.load %arg0[%c0_7, %c0_8, %c0_9] : memref<2x8x8xf32, #tpu.memory_space<vmem>>, vector<1x8x8xf32>
    %5 = vector.shape_cast %4 : vector<1x8x8xf32> to vector<8x8xf32>
    %c0_10 = arith.constant 0 : index
    %c0_11 = arith.constant 0 : index
    %c0_12 = arith.constant 0 : index
    %6 = vector.load %arg1[%c0_10, %c0_11, %c0_12] : memref<2x8x48xf32, #tpu.memory_space<vmem>>, vector<1x8x48xf32>
    %7 = vector.shape_cast %6 : vector<1x8x48xf32> to vector<8x48xf32>
    %cst = arith.constant dense<0.000000e+00> : vector<8xf32>
    %8 = vector.multi_reduction <add>, %5, %cst [1] : vector<8x8xf32> to vector<8xf32>
    %9 = vector.shape_cast %8 : vector<8xf32> to vector<8x1xf32>
    %cst_13 = arith.constant dense<0.000000e+00> : vector<8xf32>
    %10 = vector.multi_reduction <add>, %5, %cst_13 [0] : vector<8x8xf32> to vector<8xf32>
    %11 = vector.shape_cast %10 : vector<8xf32> to vector<8x1xf32>
    %cst_14 = arith.constant 1.000000e+00 : f32
    %12 = vector.broadcast %cst_14 : f32 to vector<8x1xf32>
    %13 = arith.addf %9, %12 : vector<8x1xf32>
    %14 = arith.addf %9, %11 : vector<8x1xf32>
    %cst_15 = arith.constant 0.000000e+00 : f32
    %15 = vector.broadcast %cst_15 : f32 to vector<8x1xf32>
    %16 = arith.cmpf oeq, %14, %15 : vector<8x1xf32>
    %cst_16 = arith.constant dense<0.000000e+00> : vector<8x48xf32>
    %17 = tpu.matmul %5, %7, %cst_16 {dimension_numbers = #tpu.dot_dimension_numbers<[1], [0], [0], [1], [0, 0, 1, 1], [], []>} : vector<8x8xf32>, vector<8x48xf32>, vector<8x48xf32> -> vector<8x48xf32>
    %18 = arith.addf %17, %7 : vector<8x48xf32>
    %cst_17 = arith.constant dense<0.000000e+00> : vector<8x32xf32>
    %19 = tpu.matmul %18, %0, %cst_17 {dimension_numbers = #tpu.dot_dimension_numbers<[1], [0], [0], [1], [0, 0, 1, 1], [], []>} : vector<8x48xf32>, vector<48x32xf32>, vector<8x32xf32> -> vector<8x32xf32>
    %cst_18 = arith.constant 2.000000e+00 : f32
    %20 = vector.broadcast %cst_18 : f32 to vector<1x32xf32>
    %21 = arith.mulf %20, %1 : vector<1x32xf32>
    %22 = vector.broadcast %21 : vector<1x32xf32> to vector<8x32xf32>
    %23 = arith.addf %19, %22 : vector<8x32xf32>
    %24 = vector.broadcast %13 : vector<8x1xf32> to vector<8x32xf32>
    %25 = arith.divf %23, %24 : vector<8x32xf32>
    %cst_19 = arith.constant 0.000000e+00 : f32
    %26 = vector.broadcast %cst_19 : f32 to vector<8x32xf32>
    %27 = arith.maximumf %25, %26 : vector<8x32xf32>
    %cst_20 = arith.constant dense<0.000000e+00> : vector<8x32xf32>
    %28 = tpu.matmul %5, %27, %cst_20 {dimension_numbers = #tpu.dot_dimension_numbers<[1], [0], [0], [1], [0, 0, 1, 1], [], []>} : vector<8x8xf32>, vector<8x32xf32>, vector<8x32xf32> -> vector<8x32xf32>
    %29 = arith.addf %28, %27 : vector<8x32xf32>
    %cst_21 = arith.constant dense<0.000000e+00> : vector<8x32xf32>
    %30 = tpu.matmul %29, %2, %cst_21 {dimension_numbers = #tpu.dot_dimension_numbers<[1], [0], [0], [1], [0, 0, 1, 1], [], []>} : vector<8x32xf32>, vector<32x32xf32>, vector<8x32xf32> -> vector<8x32xf32>
    %cst_22 = arith.constant 2.000000e+00 : f32
    %31 = vector.broadcast %cst_22 : f32 to vector<1x32xf32>
    %32 = arith.mulf %31, %3 : vector<1x32xf32>
    %33 = vector.broadcast %32 : vector<1x32xf32> to vector<8x32xf32>
    %34 = arith.addf %30, %33 : vector<8x32xf32>
    %35 = vector.broadcast %13 : vector<8x1xf32> to vector<8x32xf32>
    %36 = arith.divf %34, %35 : vector<8x32xf32>
    %cst_23 = arith.constant 0.000000e+00 : f32
    %37 = vector.broadcast %cst_23 : f32 to vector<8x32xf32>
    %38 = arith.maximumf %36, %37 : vector<8x32xf32>
    %c0_24 = arith.constant 0 : index
    %c0_25 = arith.constant 0 : index
    %c0_26 = arith.constant 0 : index
    %39 = vector.load %arg2[%c0_24, %c0_25, %c0_26] : memref<2x8x1xf32, #tpu.memory_space<vmem>>, vector<1x8x1xf32>
    %40 = vector.shape_cast %39 : vector<1x8x1xf32> to vector<8x1xf32>
    %cst_27 = arith.constant 5.000000e-01 : f32
    %41 = vector.broadcast %cst_27 : f32 to vector<8x1xf32>
    %42 = arith.cmpf ogt, %40, %41 : vector<8x1xf32>
    %c0_28 = arith.constant 0 : index
    %c0_29 = arith.constant 0 : index
    %c0_30 = arith.constant 0 : index
    %43 = vector.load %arg3[%c0_28, %c0_29, %c0_30] : memref<2x8x1xf32, #tpu.memory_space<vmem>>, vector<1x8x1xf32>
    %44 = vector.shape_cast %43 : vector<1x8x1xf32> to vector<8x1xf32>
    %cst_31 = arith.constant 5.000000e-01 : f32
    %45 = vector.broadcast %cst_31 : f32 to vector<8x1xf32>
    %46 = arith.cmpf ogt, %44, %45 : vector<8x1xf32>
    %cst_32 = arith.constant -9.99999995E+11 : f32
    %47 = vector.shape_cast %16 : vector<8x1xi1> to vector<8x1xi1>
    %48 = vector.broadcast %47 : vector<8x1xi1> to vector<8x32xi1>
    %49 = vector.broadcast %cst_32 : f32 to vector<8x32xf32>
    %50 = arith.select %48, %49, %38 : vector<8x32xi1>, vector<8x32xf32>
    %cst_33 = arith.constant dense<0xFF800000> : vector<32xf32>
    %51 = vector.multi_reduction <maximumf>, %50, %cst_33 [0] : vector<8x32xf32> to vector<32xf32>
    %52 = vector.shape_cast %51 : vector<32xf32> to vector<1x32xf32>
    %cst_34 = arith.constant -9.99999995E+11 : f32
    %53 = vector.shape_cast %42 : vector<8x1xi1> to vector<8x1xi1>
    %54 = vector.broadcast %53 : vector<8x1xi1> to vector<8x32xi1>
    %55 = vector.broadcast %cst_34 : f32 to vector<8x32xf32>
    %56 = arith.select %54, %55, %38 : vector<8x32xi1>, vector<8x32xf32>
    %cst_35 = arith.constant dense<0xFF800000> : vector<32xf32>
    %57 = vector.multi_reduction <maximumf>, %56, %cst_35 [0] : vector<8x32xf32> to vector<32xf32>
    %58 = vector.shape_cast %57 : vector<32xf32> to vector<1x32xf32>
    %cst_36 = arith.constant -9.99999995E+11 : f32
    %59 = vector.shape_cast %46 : vector<8x1xi1> to vector<8x1xi1>
    %60 = vector.broadcast %59 : vector<8x1xi1> to vector<8x32xi1>
    %61 = vector.broadcast %cst_36 : f32 to vector<8x32xf32>
    %62 = arith.select %60, %61, %38 : vector<8x32xi1>, vector<8x32xf32>
    %cst_37 = arith.constant dense<0xFF800000> : vector<32xf32>
    %63 = vector.multi_reduction <maximumf>, %62, %cst_37 [0] : vector<8x32xf32> to vector<32xf32>
    %64 = vector.shape_cast %63 : vector<32xf32> to vector<1x32xf32>
    %c0_38 = arith.constant 0 : index
    %c0_39 = arith.constant 0 : index
    %65 = vector.load %arg15[%c0_38, %c0_39] : memref<2x32xf32, #tpu.memory_space<vmem>>, vector<1x32xf32>
    tpu.vector_store %arg15[%c0_38, %c0_39], %52 {strides = array<i32>} : memref<2x32xf32, #tpu.memory_space<vmem>>, vector<1x32xf32>,
    %c0_40 = arith.constant 0 : index
    %c0_41 = arith.constant 0 : index
    %66 = vector.load %arg16[%c0_40, %c0_41] : memref<2x96xf32, #tpu.memory_space<vmem>>, vector<1x32xf32>
    tpu.vector_store %arg16[%c0_40, %c0_41], %52 {strides = array<i32>} : memref<2x96xf32, #tpu.memory_space<vmem>>, vector<1x32xf32>,
    %c0_42 = arith.constant 0 : index
    %c32 = arith.constant 32 : index
    %67 = vector.load %arg16[%c0_42, %c32] : memref<2x96xf32, #tpu.memory_space<vmem>>, vector<1x32xf32>
    tpu.vector_store %arg16[%c0_42, %c32], %58 {strides = array<i32>} : memref<2x96xf32, #tpu.memory_space<vmem>>, vector<1x32xf32>,
    %c0_43 = arith.constant 0 : index
    %c64 = arith.constant 64 : index
    %68 = vector.load %arg16[%c0_43, %c64] : memref<2x96xf32, #tpu.memory_space<vmem>>, vector<1x32xf32>
    tpu.vector_store %arg16[%c0_43, %c64], %64 {strides = array<i32>} : memref<2x96xf32, #tpu.memory_space<vmem>>, vector<1x32xf32>,
    %c1 = arith.constant 1 : index
    %c0_44 = arith.constant 0 : index
    %c0_45 = arith.constant 0 : index
    %69 = vector.load %arg0[%c1, %c0_44, %c0_45] : memref<2x8x8xf32, #tpu.memory_space<vmem>>, vector<1x8x8xf32>
    %70 = vector.shape_cast %69 : vector<1x8x8xf32> to vector<8x8xf32>
    %c1_46 = arith.constant 1 : index
    %c0_47 = arith.constant 0 : index
    %c0_48 = arith.constant 0 : index
    %71 = vector.load %arg1[%c1_46, %c0_47, %c0_48] : memref<2x8x48xf32, #tpu.memory_space<vmem>>, vector<1x8x48xf32>
    %72 = vector.shape_cast %71 : vector<1x8x48xf32> to vector<8x48xf32>
    %cst_49 = arith.constant dense<0.000000e+00> : vector<8xf32>
    %73 = vector.multi_reduction <add>, %70, %cst_49 [1] : vector<8x8xf32> to vector<8xf32>
    %74 = vector.shape_cast %73 : vector<8xf32> to vector<8x1xf32>
    %cst_50 = arith.constant dense<0.000000e+00> : vector<8xf32>
    %75 = vector.multi_reduction <add>, %70, %cst_50 [0] : vector<8x8xf32> to vector<8xf32>
    %76 = vector.shape_cast %75 : vector<8xf32> to vector<8x1xf32>
    %cst_51 = arith.constant 1.000000e+00 : f32
    %77 = vector.broadcast %cst_51 : f32 to vector<8x1xf32>
    %78 = arith.addf %74, %77 : vector<8x1xf32>
    %79 = arith.addf %74, %76 : vector<8x1xf32>
    %cst_52 = arith.constant 0.000000e+00 : f32
    %80 = vector.broadcast %cst_52 : f32 to vector<8x1xf32>
    %81 = arith.cmpf oeq, %79, %80 : vector<8x1xf32>
    %cst_53 = arith.constant dense<0.000000e+00> : vector<8x48xf32>
    %82 = tpu.matmul %70, %72, %cst_53 {dimension_numbers = #tpu.dot_dimension_numbers<[1], [0], [0], [1], [0, 0, 1, 1], [], []>} : vector<8x8xf32>, vector<8x48xf32>, vector<8x48xf32> -> vector<8x48xf32>
    %83 = arith.addf %82, %72 : vector<8x48xf32>
    %cst_54 = arith.constant dense<0.000000e+00> : vector<8x32xf32>
    %84 = tpu.matmul %83, %0, %cst_54 {dimension_numbers = #tpu.dot_dimension_numbers<[1], [0], [0], [1], [0, 0, 1, 1], [], []>} : vector<8x48xf32>, vector<48x32xf32>, vector<8x32xf32> -> vector<8x32xf32>
    %cst_55 = arith.constant 2.000000e+00 : f32
    %85 = vector.broadcast %cst_55 : f32 to vector<1x32xf32>
    %86 = arith.mulf %85, %1 : vector<1x32xf32>
    %87 = vector.broadcast %86 : vector<1x32xf32> to vector<8x32xf32>
    %88 = arith.addf %84, %87 : vector<8x32xf32>
    %89 = vector.broadcast %78 : vector<8x1xf32> to vector<8x32xf32>
    %90 = arith.divf %88, %89 : vector<8x32xf32>
    %cst_56 = arith.constant 0.000000e+00 : f32
    %91 = vector.broadcast %cst_56 : f32 to vector<8x32xf32>
    %92 = arith.maximumf %90, %91 : vector<8x32xf32>
    %cst_57 = arith.constant dense<0.000000e+00> : vector<8x32xf32>
    %93 = tpu.matmul %70, %92, %cst_57 {dimension_numbers = #tpu.dot_dimension_numbers<[1], [0], [0], [1], [0, 0, 1, 1], [], []>} : vector<8x8xf32>, vector<8x32xf32>, vector<8x32xf32> -> vector<8x32xf32>
    %94 = arith.addf %93, %92 : vector<8x32xf32>
    %cst_58 = arith.constant dense<0.000000e+00> : vector<8x32xf32>
    %95 = tpu.matmul %94, %2, %cst_58 {dimension_numbers = #tpu.dot_dimension_numbers<[1], [0], [0], [1], [0, 0, 1, 1], [], []>} : vector<8x32xf32>, vector<32x32xf32>, vector<8x32xf32> -> vector<8x32xf32>
    %cst_59 = arith.constant 2.000000e+00 : f32
    %96 = vector.broadcast %cst_59 : f32 to vector<1x32xf32>
    %97 = arith.mulf %96, %3 : vector<1x32xf32>
    %98 = vector.broadcast %97 : vector<1x32xf32> to vector<8x32xf32>
    %99 = arith.addf %95, %98 : vector<8x32xf32>
    %100 = vector.broadcast %78 : vector<8x1xf32> to vector<8x32xf32>
    %101 = arith.divf %99, %100 : vector<8x32xf32>
    %cst_60 = arith.constant 0.000000e+00 : f32
    %102 = vector.broadcast %cst_60 : f32 to vector<8x32xf32>
    %103 = arith.maximumf %101, %102 : vector<8x32xf32>
    %c1_61 = arith.constant 1 : index
    %c0_62 = arith.constant 0 : index
    %c0_63 = arith.constant 0 : index
    %104 = vector.load %arg2[%c1_61, %c0_62, %c0_63] : memref<2x8x1xf32, #tpu.memory_space<vmem>>, vector<1x8x1xf32>
    %105 = vector.shape_cast %104 : vector<1x8x1xf32> to vector<8x1xf32>
    %cst_64 = arith.constant 5.000000e-01 : f32
    %106 = vector.broadcast %cst_64 : f32 to vector<8x1xf32>
    %107 = arith.cmpf ogt, %105, %106 : vector<8x1xf32>
    %c1_65 = arith.constant 1 : index
    %c0_66 = arith.constant 0 : index
    %c0_67 = arith.constant 0 : index
    %108 = vector.load %arg3[%c1_65, %c0_66, %c0_67] : memref<2x8x1xf32, #tpu.memory_space<vmem>>, vector<1x8x1xf32>
    %109 = vector.shape_cast %108 : vector<1x8x1xf32> to vector<8x1xf32>
    %cst_68 = arith.constant 5.000000e-01 : f32
    %110 = vector.broadcast %cst_68 : f32 to vector<8x1xf32>
    %111 = arith.cmpf ogt, %109, %110 : vector<8x1xf32>
    %cst_69 = arith.constant -9.99999995E+11 : f32
    %112 = vector.shape_cast %81 : vector<8x1xi1> to vector<8x1xi1>
    %113 = vector.broadcast %112 : vector<8x1xi1> to vector<8x32xi1>
    %114 = vector.broadcast %cst_69 : f32 to vector<8x32xf32>
    %115 = arith.select %113, %114, %103 : vector<8x32xi1>, vector<8x32xf32>
    %cst_70 = arith.constant dense<0xFF800000> : vector<32xf32>
    %116 = vector.multi_reduction <maximumf>, %115, %cst_70 [0] : vector<8x32xf32> to vector<32xf32>
    %117 = vector.shape_cast %116 : vector<32xf32> to vector<1x32xf32>
    %cst_71 = arith.constant -9.99999995E+11 : f32
    %118 = vector.shape_cast %107 : vector<8x1xi1> to vector<8x1xi1>
    %119 = vector.broadcast %118 : vector<8x1xi1> to vector<8x32xi1>
    %120 = vector.broadcast %cst_71 : f32 to vector<8x32xf32>
    %121 = arith.select %119, %120, %103 : vector<8x32xi1>, vector<8x32xf32>
    %cst_72 = arith.constant dense<0xFF800000> : vector<32xf32>
    %122 = vector.multi_reduction <maximumf>, %121, %cst_72 [0] : vector<8x32xf32> to vector<32xf32>
    %123 = vector.shape_cast %122 : vector<32xf32> to vector<1x32xf32>
    %cst_73 = arith.constant -9.99999995E+11 : f32
    %124 = vector.shape_cast %111 : vector<8x1xi1> to vector<8x1xi1>
    %125 = vector.broadcast %124 : vector<8x1xi1> to vector<8x32xi1>
    %126 = vector.broadcast %cst_73 : f32 to vector<8x32xf32>
    %127 = arith.select %125, %126, %103 : vector<8x32xi1>, vector<8x32xf32>
    %cst_74 = arith.constant dense<0xFF800000> : vector<32xf32>
    %128 = vector.multi_reduction <maximumf>, %127, %cst_74 [0] : vector<8x32xf32> to vector<32xf32>
    %129 = vector.shape_cast %128 : vector<32xf32> to vector<1x32xf32>
    %c1_75 = arith.constant 1 : index
    %c0_76 = arith.constant 0 : index
    %130 = vector.load %arg15[%c1_75, %c0_76] : memref<2x32xf32, #tpu.memory_space<vmem>>, vector<1x32xf32>
    tpu.vector_store %arg15[%c1_75, %c0_76], %117 {strides = array<i32>} : memref<2x32xf32, #tpu.memory_space<vmem>>, vector<1x32xf32>,
    %c1_77 = arith.constant 1 : index
    %c0_78 = arith.constant 0 : index
    %131 = vector.load %arg16[%c1_77, %c0_78] : memref<2x96xf32, #tpu.memory_space<vmem>>, vector<1x32xf32>
    tpu.vector_store %arg16[%c1_77, %c0_78], %117 {strides = array<i32>} : memref<2x96xf32, #tpu.memory_space<vmem>>, vector<1x32xf32>,
    %c1_79 = arith.constant 1 : index
    %c32_80 = arith.constant 32 : index
    %132 = vector.load %arg16[%c1_79, %c32_80] : memref<2x96xf32, #tpu.memory_space<vmem>>, vector<1x32xf32>
    tpu.vector_store %arg16[%c1_79, %c32_80], %123 {strides = array<i32>} : memref<2x96xf32, #tpu.memory_space<vmem>>, vector<1x32xf32>,
    %c1_81 = arith.constant 1 : index
    %c64_82 = arith.constant 64 : index
    %133 = vector.load %arg16[%c1_81, %c64_82] : memref<2x96xf32, #tpu.memory_space<vmem>>, vector<1x32xf32>
    tpu.vector_store %arg16[%c1_81, %c64_82], %129 {strides = array<i32>} : memref<2x96xf32, #tpu.memory_space<vmem>>, vector<1x32xf32>,
    %c0_83 = arith.constant 0 : index
    %c0_84 = arith.constant 0 : index
    %134 = vector.load %arg16[%c0_83, %c0_84] : memref<2x96xf32, #tpu.memory_space<vmem>>, vector<2x96xf32>
    %c0_85 = arith.constant 0 : index
    %c0_86 = arith.constant 0 : index
    %135 = vector.load %arg8[%c0_85, %c0_86] : memref<96x32xf32, #tpu.memory_space<vmem>>, vector<96x32xf32>
    %cst_87 = arith.constant dense<0.000000e+00> : vector<2x32xf32>
    %136 = tpu.matmul %134, %135, %cst_87 {dimension_numbers = #tpu.dot_dimension_numbers<[1], [0], [0], [1], [0, 0, 1, 1], [], []>} : vector<2x96xf32>, vector<96x32xf32>, vector<2x32xf32> -> vector<2x32xf32>
    %c0_88 = arith.constant 0 : index
    %c0_89 = arith.constant 0 : index
    %137 = vector.load %arg9[%c0_88, %c0_89] : memref<1x32xf32, #tpu.memory_space<vmem>>, vector<1x32xf32>
    %138 = vector.broadcast %137 : vector<1x32xf32> to vector<2x32xf32>
    %139 = arith.addf %136, %138 : vector<2x32xf32>
    %cst_90 = arith.constant 0.000000e+00 : f32
    %140 = vector.broadcast %cst_90 : f32 to vector<2x32xf32>
    %141 = arith.maximumf %139, %140 : vector<2x32xf32>
    %c0_91 = arith.constant 0 : index
    %c0_92 = arith.constant 0 : index
    %142 = vector.load %arg10[%c0_91, %c0_92] : memref<32x32xf32, #tpu.memory_space<vmem>>, vector<32x32xf32>
    %cst_93 = arith.constant dense<0.000000e+00> : vector<2x32xf32>
    %143 = tpu.matmul %141, %142, %cst_93 {dimension_numbers = #tpu.dot_dimension_numbers<[1], [0], [0], [1], [0, 0, 1, 1], [], []>} : vector<2x32xf32>, vector<32x32xf32>, vector<2x32xf32> -> vector<2x32xf32>
    %c0_94 = arith.constant 0 : index
    %c0_95 = arith.constant 0 : index
    %144 = vector.load %arg11[%c0_94, %c0_95] : memref<1x32xf32, #tpu.memory_space<vmem>>, vector<1x32xf32>
    %145 = vector.broadcast %144 : vector<1x32xf32> to vector<2x32xf32>
    %146 = arith.addf %143, %145 : vector<2x32xf32>
    %cst_96 = arith.constant 0.000000e+00 : f32
    %147 = vector.broadcast %cst_96 : f32 to vector<2x32xf32>
    %148 = arith.maximumf %146, %147 : vector<2x32xf32>
    %c0_97 = arith.constant 0 : index
    %c0_98 = arith.constant 0 : index
    %149 = vector.load %arg12[%c0_97, %c0_98] : memref<32x128xf32, #tpu.memory_space<vmem>>, vector<32x128xf32>
    %cst_99 = arith.constant dense<0.000000e+00> : vector<2x128xf32>
    %150 = tpu.matmul %148, %149, %cst_99 {dimension_numbers = #tpu.dot_dimension_numbers<[1], [0], [0], [1], [0, 0, 1, 1], [], []>} : vector<2x32xf32>, vector<32x128xf32>, vector<2x128xf32> -> vector<2x128xf32>
    %c0_100 = arith.constant 0 : index
    %c0_101 = arith.constant 0 : index
    %151 = vector.load %arg13[%c0_100, %c0_101] : memref<1x128xf32, #tpu.memory_space<vmem>>, vector<1x128xf32>
    %152 = vector.broadcast %151 : vector<1x128xf32> to vector<2x128xf32>
    %153 = arith.addf %150, %152 : vector<2x128xf32>
    %c0_102 = arith.constant 0 : index
    %c0_103 = arith.constant 0 : index
    %154 = vector.load %arg14[%c0_102, %c0_103] : memref<2x128xf32, #tpu.memory_space<vmem>>, vector<2x128xf32>
    tpu.vector_store %arg14[%c0_102, %c0_103], %153 {strides = array<i32>} : memref<2x128xf32, #tpu.memory_space<vmem>>, vector<2x128xf32>,
    return
  }
}

</mosaic_0001>

<bundles_post_ra>
// kernel: _forward_core.1
= control target key start
LH: loop header
LB: loop body
LE: loop exit
PB: predicated region body
PF: predicated region fallthrough
CT: control target
= control target key end

     0   :  { %21 = vsyncpa [#allocation4], 0  ;;  %vm65_vm0 = vcmask 64512   ;;  %v1357_v2 = vmov 0.0   ;;  %vm1358_vm1 = vmmov 0   ;;  %s1772_s0 = inlined_call_operand.vmem [shape: f32[2,8,8], index: 0, kind: input, shape index: {}]   ;;  %s1773_s1 = inlined_call_operand.vmem [shape: f32[2,8,48], index: 1, kind: input, shape index: {}]   ;;  %s1774_s2 = inlined_call_operand.vmem [shape: f32[2,8,1], index: 2, kind: input, shape index: {}]   ;;  %s1775_s3 = inlined_call_operand.vmem [shape: f32[2,8,1], index: 3, kind: input, shape index: {}]   ;;  %s1776_s4 = inlined_call_operand.vmem [shape: f32[48,32], index: 4, kind: input, shape index: {}]   ;;  %s1777_s5 = inlined_call_operand.vmem [shape: f32[1,32], index: 5, kind: input, shape index: {}]   ;;  %s1778_s6 = inlined_call_operand.vmem [shape: f32[32,32], index: 6, kind: input, shape index: {}]   ;;  %s1779_s7 = inlined_call_operand.vmem [shape: f32[1,32], index: 7, kind: input, shape index: {}]   ;;  %s1780_s8 = inlined_call_operand.vmem [shape: f32[96,32], index: 8, kind: input, shape index: {}]   ;;  %s1781_s9 = inlined_call_operand.vmem [shape: f32[1,32], index: 9, kind: input, shape index: {}]   ;;  %s1782_s10 = inlined_call_operand.vmem [shape: f32[32,32], index: 10, kind: input, shape index: {}]   ;;  %s1783_s11 = inlined_call_operand.vmem [shape: f32[1,32], index: 11, kind: input, shape index: {}]   ;;  %s1784_s12 = inlined_call_operand.vmem [shape: f32[32,128], index: 12, kind: input, shape index: {}]   ;;  %s1785_s13 = inlined_call_operand.vmem [shape: f32[1,128], index: 13, kind: input, shape index: {}]   ;;  %s1786_s14 = inlined_call_operand.hbm [shape: f32[2,128], index: 14, kind: output, shape index: {0}]   ;;  %s1787_s15 = inlined_call_operand.hbm [shape: f32[2,32], index: 15, kind: output, shape index: {1}]  }
   0x1   :  { %v64_v0 = vld [vmem:[%s1773_s1] sm:$0xff]  ;;  %1179 = vmatprep.subr.mxu1 %v1357_v2  ;;  %1181 = vmatprep.mubr.msk.f32.mxu1 %vm1358_vm1, %v1357_v2  ;;  %v1458_v3 = vld [vmem:[%s1776_s4 + $0x28] sm:$0xff] }
   0x2   :  { %v1450_v1 = vld [vmem:[%s1772_s0] sm:$0xff]  ;;  %1180 = vmatpush3.msra.mxu1 %v64_v0  ;;  %1199 = vmatprep.subr.mxu0 %v1357_v2 }
   0x3   :  { %22 = vsyncpa [#allocation6], 0  ;;  %1182 = vmatmul.mubr.msk.f32.vlgmr.msra.gmra.mxu1 %vm65_vm0, %v1450_v1  ;;  %1184 = vmatprep.subr.mxu1 %v1357_v2  ;;  %v1467_v4 = vld [vmem:[%s1776_s4 + $0x20] sm:$0xff]  ;;  %v1476_v5 = vld [vmem:[%s1776_s4 + $0x18] sm:$0xff]  ;;  %v66_v9 = vsel %vm65_vm0, %v1450_v1, 0.0  ;;  %v1359_v13 = vmov 0   ;;  %v156_v30 = vlaneseq }
   0x4   :  { %1185 = vmatpush3.msra.mxu1 %v1458_v3  ;;  %1196 = vmatprep.mubr.msk.f32.mxu1 %vm1358_vm1, %v1357_v2  ;;  %v1485_v6 = vld [vmem:[%s1776_s4 + $0x10] sm:$0xff]  ;;  %v1494_v7 = vld [vmem:[%s1776_s4 + $0x8] sm:$0xff]  ;;  %v1501_v8 = vld [vmem:[%s1776_s4] sm:$0xff]  ;;  %v69_v12 = vrot.slane %v66_v9, 4  ;;  %vm161_vm5 = vcmask 392192   ;;  %vm315_vm7 = vcmask 261120  }
   0x5   :  { %1186 = vmatprep.subr.mxu1 %v1357_v2  ;;  %1201 = vmatprep.mubr.msk.f32.mxu0 %vm1358_vm1, %v1357_v2  ;;  %v391_v10 = vld [vmem:[%s1774_s2] sm:$0xff]  ;;  %v1116_v11 = vld [vmem:[%s1774_s2 + $0x8] sm:$0xff]  ;;  %v1543_v31 = vshrl.u32 %v156_v30, 7  ;;  %v1560_v42 = vld [vmem:[%s1778_s6 + $0x18] sm:$0xff]  ;;  %vm431_vm11 = vcmask 253952   ;;  %s1361_s21 = smov 64  }
   0x6   :  { %1187 = vmatpush3.msra.mxu1 %v1467_v4  ;;  %67 = vadd.xlane.f32.xlu0 %v66_v9  ;;  %vm392_vm2 = vcmp.gt.f32.partialorder %v391_v10, 0.5  ;;  %vm761_vm3 = vcmp.gt.f32.partialorder %v1116_v11, 0.5  ;;  %v1117_v15 = vld [vmem:[%s1775_s3 + $0x8] sm:$0xff]  ;;  %v70_v16 = vadd.f32 %v69_v12, %v66_v9  ;;  %v57_v32 = vld [vmem:[%s1777_s5] sm:$0x1]  ;;  %v1568_v43 = vld [vmem:[%s1778_s6 + $0x10] sm:$0xff] }
   0x7   :  { %1188 = vmatprep.subr.mxu1 %v1357_v2  ;;  %1307 = vset.pattern.permute.xlu1 %v1359_v13  ;;  %v405_v14 = vsel %vm392_vm2, 1, %v1359_v13  ;;  %v775_v17 = vsel %vm761_vm3, 1, %v1359_v13  ;;  %vm764_vm4 = vcmp.gt.f32.partialorder %v1117_v15, 0.5  ;;  %v1527_v26 = vld [vmem:[%s1773_s1 + $0x8] sm:$0xff]  ;;  %v154_v33 = vmul.f32 2.0, %v57_v32  ;;  %v1586_v45 = vld [vmem:[%s1778_s6] sm:$0xff] }
   0x8   :  { %1189 = vmatpush3.msra.mxu1 %v1476_v5  ;;  %1308 = vset.pattern.permute.xlu0 %v1359_v13  ;;  %v71_v18 = vrot.slane %v70_v16, 2  ;;  %v788_v20 = vsel %vm764_vm4, 1, %v1359_v13  ;;  %v1532_v27 = vld [vmem:[%s1772_s0 + $0x8] sm:$0xff]  ;;  %v158_v34 = vsub.s32 0, %v1543_v31  ;;  %v393_v55 = vld [vmem:[%s1775_s3] sm:$0xff]  ;;  %vm438_vm12 = vcmask 516352  }
   0x9   :  { %1190 = vmatprep.subr.mxu1 %v1357_v2  ;;  %407 = vperm.xlu1 %1307, %v405_v14   ;;  %v1577_v44 = vld [vmem:[%s1778_s6 + $0x8] sm:$0xff]  ;;  %v450_v48 = vsel %vm65_vm0, %v1532_v27, 0.0  ;;  %vm394_vm6 = vcmp.gt.f32.partialorder %v393_v55, 0.5  ;;  %v62_v63 = vld [vmem:[%s1779_s7] sm:$0x1]  ;;  %s1360_s7 = smov 32  }
   0xa   :  { %1191 = vmatpush3.msra.mxu1 %v1485_v6  ;;  %v72_v19 = vadd.f32 %v71_v18, %v70_v16  ;;  %v1551_v35 = vrot.slane %v154_v33, %v158_v34  ;;  %v453_v49 = vrot.slane %v450_v48, 4  ;;  %451 = vadd.xlane.f32.xlu0 %v450_v48  ;;  %v418_v56 = vsel %vm394_vm6, 1, %v1359_v13  ;;  %v820_v55 = vld [vmem:[%s1780_s8 + $0x30] sm:$0xff]  ;;  %s1362_s6 = smov [#allocation5]  }
   0xb   :  { %1192 = vmatprep.subr.mxu1 %v1357_v2  ;;  %vm444_vm13 = vcmask 778752   ;;  %vm833_vm2 = vcmask 785408   ;;  %s1094_s3 = sshll.u32 %s1362_s6, 4  ;;  %s1095_s3 = int_to_ptr.vmem [resolvable:$true] %s1094_s3 }
   0xc   :  { %1193 = vmatpush3.msra.mxu1 %v1494_v7  ;;  %v73_v21 = vrot.slane %v72_v19, 1  ;;  %v454_v50 = vadd.f32 %v453_v49, %v450_v48  ;;  %s1313_s20 = scalar_lea.vmem %s1095_s3, 32  ;;  %p1318_p1 = scmp.lt.s32.totalorder %s1095_s3, %s1095_s3 }
   0xd   :  { %1194 = vmatprep.subr.mxu1 %v1357_v2  ;;  %777 = vperm.xlu1 %1307, %v775_v17   ;;  %p1314_p0 = scmp.ne.s32.totalorder %s1095_s3, %s1313_s20  ;;  %p1319_p2 = scmp.lt.s32.totalorder %s1313_s20, %s1313_s20 }
   0xe   :  { %1195 = vmatpush3.msra.mxu1 %v1501_v8  ;;  %v74_v22 = vadd.f32 %v73_v21, %v72_v19  ;;  %v455_v51 = vrot.slane %v454_v50, 2 }
   0xf   :  { %1215 = vmatprep.subr.mxu1 %v1357_v2  ;;  %p1320_p3 = por %p1319_p2, %p1318_p1 }
  0x10   :  { %v456_v52 = vadd.f32 %v455_v51, %v454_v50 }
  0x11   :  { %790 = vperm.xlu1 %1307, %v788_v20   ;;  %p1321_p4 = pnand %p1320_p3, %p1314_p0 }
  0x12   :  { %v457_v53 = vrot.slane %v456_v52, 1 }
  0x14   :  { %v458_v54 = vadd.f32 %v457_v53, %v456_v52  ;;  %v823_v52 = vld [vmem:[%s1780_s8 + $0x48] sm:$0xff]  ;;  %v822_v53 = vld [vmem:[%s1780_s8 + $0x40] sm:$0xff] }
  0x15   :  { %76 = vbcast.lane.b32.xlu1 %v74_v22, 256 }
  0x19   :  { %460 = vbcast.lane.b32.xlu1 %v458_v54, 256  ;;  %v821_v54 = vld [vmem:[%s1780_s8 + $0x38] sm:$0xff] }
  0x20   :  { %420 = vperm.xlu0 %1308, %v418_v56  }
  0x84   :  { %v408_v61 = vpop.permute.xlu1 %407 }
  0x85   :  { %vm409_vm8 = vcmp.eq.s32.totalorder %v408_v61, 1 }
  0x88   :  { %v1615_v62 = vpop.permute.xlu1 %777 }
  0x89   :  { %vm779_vm14 = vcmp.eq.s32.totalorder %v1615_v62, 1  ;;  %v818_v62 = vld [vmem:[%s1780_s8 + $0x20] sm:$0xff] }
  0x8f   :  { %v1540_v28 = vpop.xlane.xlu0 %67 }
  0x90   :  { %v78_v29 = vadd.f32 1.0, %v1540_v28 }
  0x92   :  { %1309 = vrcp.f32 %v78_v29 }
  0x9f   :  { %v1553_v36 = vpop.eup %1309 }
  0xc3   :  { %v150_v23 = vpop.f32.mrf.mxu1 }
  0xc4   :  { %v151_v24 = vadd.f32 %v150_v23, %v64_v0  ;;  %v1620_v0 = vpop.xlane.xlu0 %451 }
  0xc5   :  { %v1183_v25 = vpop.f32.mrf.mxu1 }
  0xc6   :  { %1197 = vmatmul.mubr.msk.f32.vlgmr.msra.gmra.mxu1 %vm161_vm5, %v151_v24 }
  0xc7   :  { %1217 = vmatprep.mubr.msk.f32.mxu1 %vm1358_vm1, %v1357_v2  ;;  %1216 = vmatpush3.msra.mxu1 %v1527_v26 }
  0xc8   :  { %1235 = vmatprep.subr.mxu1 %v1357_v2  ;;  %v421_v9 = vpop.permute.xlu0 %420 }
  0xc9   :  { %vm422_vm9 = vcmp.eq.s32.totalorder %v421_v9, 1 }
  0xca   :  { %1218 = vmatmul.mubr.msk.f32.vlgmr.msra.gmra.mxu1 %vm65_vm0, %v1532_v27 }
  0xcb   :  { %1237 = vmatprep.mubr.msk.f32.mxu1 %vm1358_vm1, %v1357_v2 }
 0x186   :  { %v231_v37 = vpop.f32.mrf.mxu1 }
 0x187   :  { %v232_v38 = vadd.f32 %v231_v37, %v1551_v35 }
 0x188   :  { %v1198_v39 = vpop.f32.mrf.mxu1 }
 0x189   :  { %v236_v40 = vmul.f32 %v1553_v36, %v232_v38 }
 0x18a   :  { %v534_v46 = vpop.f32.mrf.mxu1 }
 0x18b   :  { %v237_v41 = vmax.f32 %v236_v40, 0.0  ;;  %v535_v60 = vadd.f32 %v1527_v26, %v534_v46 }
 0x18c   :  { %v1219_v47 = vpop.f32.mrf.mxu1 }
 0x18d   :  { %1200 = vmatpush3.msra.mxu0 %v237_v41 }
 0x18e   :  { %1202 = vmatmul.mubr.msk.f32.vlgmr.msra.gmra.mxu0 %vm65_vm0, %v1450_v1  ;;  %1204 = vmatprep.subr.mxu0 %v1357_v2  ;;  %v1622_v1 = vpop.permute.xlu1 %790 }
 0x18f   :  { %1205 = vmatpush3.msra.mxu0 %v1560_v42  ;;  %1212 = vmatprep.mubr.msk.f32.mxu0 %vm1358_vm1, %v1357_v2  ;;  %vm792_vm15 = vcmp.eq.s32.totalorder %v1622_v1, 1 }
 0x190   :  { %1206 = vmatprep.subr.mxu0 %v1357_v2 }
 0x191   :  { %1207 = vmatpush3.msra.mxu0 %v1568_v43 }
 0x192   :  { %1208 = vmatprep.subr.mxu0 %v1357_v2 }
 0x193   :  { %1209 = vmatpush3.msra.mxu0 %v1577_v44 }
 0x194   :  { %1210 = vmatprep.subr.mxu0 %v1357_v2 }
 0x195   :  { %1211 = vmatpush3.msra.mxu0 %v1586_v45 }
 0x196   :  { %1220 = vmatprep.subr.mxu0 %v1357_v2 }
 0x24e   :  { %v304_v57 = vpop.f32.mrf.mxu0 }
 0x24f   :  { %v305_v58 = vadd.f32 %v304_v57, %v237_v41 }
 0x250   :  { %v1203_v59 = vpop.f32.mrf.mxu0 }
 0x251   :  { %1213 = vmatmul.mubr.msk.f32.vlgmr.msra.gmra.mxu0 %vm315_vm7, %v305_v58 }
 0x252   :  { %1221 = vmatpush3.msra.mxu0 %v1458_v3  ;;  %1232 = vmatprep.mubr.msk.f32.mxu0 %vm1358_vm1, %v1357_v2  ;;  %v308_v3 = vmul.f32 2.0, %v62_v63 }
 0x253   :  { %1222 = vmatprep.subr.mxu0 %v1357_v2 }
 0x254   :  { %1223 = vmatpush3.msra.mxu0 %v1467_v4  ;;  %v462_v4 = vadd.f32 1.0, %v1620_v0 }
 0x255   :  { %1224 = vmatprep.subr.mxu0 %v1357_v2 }
 0x256   :  { %1225 = vmatpush3.msra.mxu0 %v1476_v5  ;;  %v1627_v5 = vrot.slane %v308_v3, %v158_v34  ;;  %1311 = vrcp.f32 %v462_v4 }
 0x257   :  { %1226 = vmatprep.subr.mxu0 %v1357_v2 }
 0x258   :  { %1227 = vmatpush3.msra.mxu0 %v1485_v6  ;;  %v77_v6 = vpop.permute.xlu1 %76 }
 0x259   :  { %1228 = vmatprep.subr.mxu0 %v1357_v2  ;;  %v79_v10 = vadd.f32 %v77_v6, %v1540_v28 }
 0x25a   :  { %1229 = vmatpush3.msra.mxu0 %v1494_v7 }
 0x25b   :  { %1230 = vmatprep.subr.mxu0 %v1357_v2  ;;  %vm80_vm10 = vcmp.eq.f32.partialorder %v79_v10, 0.0 }
 0x25c   :  { %1231 = vmatpush3.msra.mxu0 %v1501_v8 }
 0x25d   :  { %1233 = vmatmul.mubr.msk.f32.vlgmr.msra.gmra.mxu0 %vm161_vm5, %v535_v60  ;;  %1251 = vmatprep.subr.mxu0 %v1357_v2 }
 0x25e   :  { %1275 = vmatprep.mubr.msk.f32.mxu0 %vm1358_vm1, %v1357_v2 }
 0x263   :  { %v1635_v26 = vpop.eup %1311 }
 0x311   :  { %v385_v7 = vpop.f32.mrf.mxu0 }
 0x312   :  { %v386_v8 = vadd.f32 %v385_v7, %v1627_v5 }
 0x313   :  { %v1214_v11 = vpop.f32.mrf.mxu0 }
 0x314   :  { %v389_v12 = vmul.f32 %v1553_v36, %v386_v8 }
 0x316   :  { %v390_v13 = vmax.f32 %v389_v12, 0.0 }
 0x318   :  { %v397_v14 = vsel %vm80_vm10, -1e+12, %v390_v13  ;;  %v410_v15 = vsel %vm409_vm8, -1e+12, %v390_v13  ;;  %v423_v16 = vsel %vm422_vm9, -1e+12, %v390_v13 }
 0x319   :  { %v398_v17 = vsel %vm315_vm7, %v397_v14, -inf  ;;  %v411_v18 = vsel %vm315_vm7, %v410_v15, -inf  ;;  %v424_v19 = vsel %vm315_vm7, %v423_v16, -inf  ;;  %v817_v13 = vld [vmem:[%s1780_s8 + $0x18] sm:$0xff]  ;;  %v816_v14 = vld [vmem:[%s1780_s8 + $0x10] sm:$0xff] }
 0x31a   :  { %v399_v20 = vrot.slane %v398_v17, 4  ;;  %v412_v21 = vrot.slane %v411_v18, 4  ;;  %v425_v22 = vrot.slane %v424_v19, 4 }
 0x31c   :  { %v400_v23 = vmax.f32 %v398_v17, %v399_v20  ;;  %v426_v24 = vmax.f32 %v424_v19, %v425_v22  ;;  %v413_v25 = vmax.f32 %v411_v18, %v412_v21  ;;  %v815_v18 = vld [vmem:[%s1780_s8 + $0x8] sm:$0xff]  ;;  %v814_v22 = vld [vmem:[%s1780_s8] sm:$0xff] }
 0x31d   :  { %v607_v28 = vpop.f32.mrf.mxu0 }
 0x31e   :  { %v427_v29 = vrot.slane %v426_v24, 2  ;;  %v608_v30 = vadd.f32 %v607_v28, %v1551_v35  ;;  %v414_v31 = vrot.slane %v413_v25, 2  ;;  %v401_v32 = vrot.slane %v400_v23, 2 }
 0x31f   :  { %v1234_v33 = vpop.f32.mrf.mxu0 }
 0x320   :  { %v428_v34 = vmax.f32 %v426_v24, %v427_v29  ;;  %v612_v36 = vmul.f32 %v1635_v26, %v608_v30  ;;  %v415_v37 = vmax.f32 %v413_v25, %v414_v31  ;;  %v402_v38 = vmax.f32 %v400_v23, %v401_v32  ;;  %v911_v29 = vld [vmem:[%s1782_s10 + $0x18] sm:$0xff] }
 0x322   :  { %v613_v39 = vmax.f32 %v612_v36, 0.0  ;;  %v416_v40 = vrot.slane %v415_v37, 1  ;;  %v403_v41 = vrot.slane %v402_v38, 1  ;;  %v429_v47 = vrot.slane %v428_v34, 1  ;;  %v909_v36 = vld [vmem:[%s1782_s10 + $0x8] sm:$0xff] }
 0x324   :  { %1236 = vmatpush3.msra.mxu1 %v613_v39  ;;  %v417_v46 = vmax.f32 %v415_v37, %v416_v40  ;;  %v404_v48 = vmax.f32 %v402_v38, %v403_v41  ;;  %v430_v35 = vmax.f32 %v428_v34, %v429_v47  ;;  %v910_v34 = vld [vmem:[%s1782_s10 + $0x10] sm:$0xff]  ;;  %v908_v37 = vld [vmem:[%s1782_s10] sm:$0xff]  ;;  %v996_v47 = vld [vmem:[%s1784_s12 + $0x18] sm:$0xff] }
 0x325   :  { %1238 = vmatmul.mubr.msk.f32.vlgmr.msra.gmra.mxu1 %vm65_vm0, %v1532_v27  ;;  %1240 = vmatprep.subr.mxu1 %v1357_v2  ;;  %v461_v27 = vpop.permute.xlu1 %460  ;;  %v1118_v38 = vld [vmem:[%s1781_s9] ss:$0 sm:$0xff] }
 0x326   :  { %435 = vrot.lane.b32.xlu1 %v417_v46, %s1360_s7  ;;  %433 = vst.msk [vmem:[#allocation2] sm:$0x1] %vm431_vm11, %v404_v48  ;;  %432 = vst.msk [vmem:[#allocation5] sm:$0x1] %vm431_vm11, %v404_v48  ;;  %1241 = vmatpush3.msra.mxu1 %v1560_v42  ;;  %v463_v58 = vadd.f32 %v461_v27, %v1620_v0  ;;  %v819_v0 = vld [vmem:[%s1780_s8 + $0x28] sm:$0xff]  ;;  %v995_v48 = vld [vmem:[%s1784_s12 + $0x10] sm:$0xff] }
 0x327   :  { %1242 = vmatprep.subr.mxu1 %v1357_v2  ;;  %1248 = vmatprep.mubr.msk.f32.mxu1 %vm1358_vm1, %v1357_v2  ;;  %v993_v27 = vld [vmem:[%s1784_s12] sm:$0xff] }
 0x328   :  { %1243 = vmatpush3.msra.mxu1 %v1568_v43  ;;  %vm464_vm0 = vcmp.eq.f32.partialorder %v463_v58, 0.0 }
 0x329   :  { %1244 = vmatprep.subr.mxu1 %v1357_v2 }
 0x32a   :  { %441 = vrot.lane.b32.xlu1 %v430_v35, %s1361_s21  ;;  %1245 = vmatpush3.msra.mxu1 %v1577_v44  ;;  %v825_v44 = vld [vmem:[%s1780_s8 + $0x58] sm:$0xff]  ;;  %v994_v35 = vld [vmem:[%s1784_s12 + $0x8] sm:$0xff] }
 0x32b   :  { %1246 = vmatprep.subr.mxu1 %v1357_v2  ;;  %1252 = vmatpush3.msra.mxu0 %v825_v44 }
 0x32c   :  { %1247 = vmatpush3.msra.mxu1 %v1586_v45  ;;  %v824_v45 = vld [vmem:[%s1780_s8 + $0x50] sm:$0xff]  ;;  %1253 = vmatprep.subr.mxu0 %v1357_v2 }
 0x32d   :  { %1278 = vmatprep.subr.mxu1 %v1357_v2  ;;  %1254 = vmatpush3.msra.mxu0 %v824_v45 }
 0x32e   :  { %1255 = vmatprep.subr.mxu0 %v1357_v2 }
 0x32f   :  { %1256 = vmatpush3.msra.mxu0 %v823_v52 }
 0x330   :  { %1257 = vmatprep.subr.mxu0 %v1357_v2 }
 0x331   :  { %1258 = vmatpush3.msra.mxu0 %v822_v53 }
 0x332   :  { %1259 = vmatprep.subr.mxu0 %v1357_v2 }
 0x333   :  { %1260 = vmatpush3.msra.mxu0 %v821_v54 }
 0x334   :  { %1261 = vmatprep.subr.mxu0 %v1357_v2 }
 0x335   :  { %1262 = vmatpush3.msra.mxu0 %v820_v55 }
 0x336   :  { %1263 = vmatprep.subr.mxu0 %v1357_v2 }
 0x337   :  { %1264 = vmatpush3.msra.mxu0 %v819_v0 }
 0x338   :  { %1265 = vmatprep.subr.mxu0 %v1357_v2 }
 0x339   :  { %1266 = vmatpush3.msra.mxu0 %v818_v62 }
 0x33a   :  { %1267 = vmatprep.subr.mxu0 %v1357_v2 }
 0x33b   :  { %1268 = vmatpush3.msra.mxu0 %v817_v13 }
 0x33c   :  { %1269 = vmatprep.subr.mxu0 %v1357_v2 }
 0x33d   :  { %1270 = vmatpush3.msra.mxu0 %v816_v14 }
 0x33e   :  { %1271 = vmatprep.subr.mxu0 %v1357_v2 }
 0x33f   :  { %1272 = vmatpush3.msra.mxu0 %v815_v18 }
 0x340   :  { %1273 = vmatprep.subr.mxu0 %v1357_v2 }
 0x341   :  { %1274 = vmatpush3.msra.mxu0 %v814_v22 }
 0x398   :  { %v436_v42 = vpop.permute.xlu1 %435 }
 0x399   :  { %439 = vst.msk [vmem:[#allocation2] sm:$0x1] %vm438_vm12, %v436_v42  ;;  %v1120_v42 = vld [vmem:[%s1783_s11] ss:$0 sm:$0xff] }
 0x39c   :  { %v442_v43 = vpop.permute.xlu1 %441 }
 0x39d   :  { %445 = vst.msk [vmem:[#allocation2] sm:$0x1] %vm444_vm13, %v442_v43 }
 0x3e5   :  { %v680_v49 = vpop.f32.mrf.mxu1 }
 0x3e6   :  { %v681_v50 = vadd.f32 %v680_v49, %v613_v39 }
 0x3e7   :  { %v1239_v51 = vpop.f32.mrf.mxu1 }
 0x3e8   :  { %1249 = vmatmul.mubr.msk.f32.vlgmr.msra.gmra.mxu1 %vm315_vm7, %v681_v50 }
 0x3e9   :  { %1286 = vmatprep.mubr.msk.f32.mxu1 %vm1358_vm1, %v1357_v2  ;;  %1279 = vmatpush3.msra.mxu1 %v911_v29 }
 0x3ea   :  { %1280 = vmatprep.subr.mxu1 %v1357_v2 }
 0x3eb   :  { %1281 = vmatpush3.msra.mxu1 %v910_v34 }
 0x3ec   :  { %1282 = vmatprep.subr.mxu1 %v1357_v2 }
 0x3ed   :  { %1283 = vmatpush3.msra.mxu1 %v909_v36 }
 0x3ee   :  { %1284 = vmatprep.subr.mxu1 %v1357_v2 }
 0x3ef   :  { %1285 = vmatpush3.msra.mxu1 %v908_v37 }
 0x3f0   :  { %1289 = vmatprep.subr.mxu1 %v1357_v2 }
 0x4a8   :  { %v753_v56 = vpop.f32.mrf.mxu1 }
 0x4a9   :  { %v754_v57 = vadd.f32 %v753_v56, %v1627_v5 }
 0x4aa   :  { %v1250_v59 = vpop.f32.mrf.mxu1 }
 0x4ab   :  { %v757_v60 = vmul.f32 %v1635_v26, %v754_v57 }
 0x4ad   :  { %v758_v61 = vmax.f32 %v757_v60, 0.0 }
 0x4af   :  { %v767_v63 = vsel %vm464_vm0, -1e+12, %v758_v61  ;;  %v780_v3 = vsel %vm779_vm14, -1e+12, %v758_v61  ;;  %v793_v4 = vsel %vm792_vm15, -1e+12, %v758_v61 }
 0x4b0   :  { %v768_v6 = vsel %vm315_vm7, %v767_v63, -inf  ;;  %v781_v7 = vsel %vm315_vm7, %v780_v3, -inf  ;;  %v794_v5 = vsel %vm315_vm7, %v793_v4, -inf }
 0x4b1   :  { %v769_v8 = vrot.slane %v768_v6, 4  ;;  %v782_v1 = vrot.slane %v781_v7, 4  ;;  %v795_v9 = vrot.slane %v794_v5, 4 }
 0x4b3   :  { %v770_v10 = vmax.f32 %v768_v6, %v769_v8  ;;  %v783_v11 = vmax.f32 %v781_v7, %v782_v1  ;;  %v796_v12 = vmax.f32 %v794_v5, %v795_v9 }
 0x4b5   :  { %v784_v15 = vrot.slane %v783_v11, 2  ;;  %v797_v16 = vrot.slane %v796_v12, 2  ;;  %v771_v17 = vrot.slane %v770_v10, 2 }
 0x4b7   :  { %v785_v19 = vmax.f32 %v783_v11, %v784_v15  ;;  %v798_v20 = vmax.f32 %v796_v12, %v797_v16  ;;  %v772_v21 = vmax.f32 %v770_v10, %v771_v17 }
 0x4b9   :  { %v786_v23 = vrot.slane %v785_v19, 1  ;;  %v773_v24 = vrot.slane %v772_v21, 1  ;;  %v799_v26 = vrot.slane %v798_v20, 1 }
 0x4bb   :  { %v787_v25 = vmax.f32 %v785_v19, %v786_v23  ;;  %v774_v28 = vmax.f32 %v772_v21, %v773_v24  ;;  %v800_v30 = vmax.f32 %v798_v20, %v799_v26 }
 0x4bd   :  { %804 = vrot.lane.b32.xlu1 %v787_v25, %s1360_s7  ;;  %802 = vst.msk [vmem:[#allocation2 + $0x1] sm:$0x1] %vm431_vm11, %v774_v28  ;;  %801 = vst.msk [vmem:[#allocation5 + $0x1] sm:$0x1] %vm431_vm11, %v774_v28 }
 0x4c1   :  { %809 = vrot.lane.b32.xlu1 %v800_v30, %s1361_s21 }
 0x52f   :  { %v805_v31 = vpop.permute.xlu1 %804 }
 0x530   :  { %807 = vst.msk [vmem:[#allocation2 + $0x1] sm:$0x1] %vm438_vm12, %v805_v31 }
 0x533   :  { %v810_v32 = vpop.permute.xlu1 %809 }
 0x534   :  { %812 = vst.msk [vmem:[#allocation2 + $0x1] sm:$0x1] %vm444_vm13, %v810_v32 }
 0x53b   :  { %v813_v33 = vld [vmem:[#allocation2] sm:$0x3] }
 0x53c   :  { %1276 = vmatmul.mubr.msk.f32.vlgmr.msra.gmra.mxu0 %vm833_vm2, %v813_v33 }
 0x5fc   :  { %v903_v39 = vpop.f32.mrf.mxu0 }
 0x5fd   :  { %v904_v40 = vadd.f32 %v1118_v38, %v903_v39 }
 0x5fe   :  { %v1277_v41 = vpop.f32.mrf.mxu0 }
 0x5ff   :  { %v907_v46 = vmax.f32 %v904_v40, 0.0 }
 0x601   :  { %1287 = vmatmul.mubr.msk.f32.vlgmr.msra.gmra.mxu1 %vm315_vm7, %v907_v46 }
 0x602   :  { %1290 = vmatpush3.msra.mxu1 %v996_v47  ;;  %1297 = vmatprep.mubr.msk.f32.mxu1 %vm1358_vm1, %v1357_v2 }
 0x603   :  { %1291 = vmatprep.subr.mxu1 %v1357_v2 }
 0x604   :  { %1292 = vmatpush3.msra.mxu1 %v995_v48 }
 0x605   :  { %1293 = vmatprep.subr.mxu1 %v1357_v2 }
 0x606   :  { %1294 = vmatpush3.msra.mxu1 %v994_v35 }
 0x607   :  { %1295 = vmatprep.subr.mxu1 %v1357_v2 }
 0x608   :  { %1296 = vmatpush3.msra.mxu1 %v993_v27 }
 0x6c1   :  { %v988_v43 = vpop.f32.mrf.mxu1 }
 0x6c2   :  { %v989_v49 = vadd.f32 %v1120_v42, %v988_v43 }
 0x6c3   :  { %v1288_v50 = vpop.f32.mrf.mxu1 }
 0x6c4   :  { %v992_v51 = vmax.f32 %v989_v49, 0.0 }
 0x6c6   :  { %1298 = vmatmul.mubr.msk.f32.vlgmr.msra.gmra.mxu1 %vm315_vm7, %v992_v51 }
 0x6c7   :  { %1324 = shalt.err (!%p1321_p4)
}
 0x6c8   :  { %1097 = dma.vmem_to_hbm [thread:$0]  %s1095_s3, 32, %s1787_s15, [#allocation6]   ;;  %v1122_v2 = vld [vmem:[%s1785_s13] ss:$0 sm:$0xff] }
 0x6c9   :  { %s1363_s23 = smov [#allocation3]  }
 0x6ca   :  { %s1084_s2 = sshll.u32 %s1363_s23, 4  ;;  %s1085_s2 = int_to_ptr.vmem [resolvable:$true] %s1084_s2 }
 0x6cb   :  { %s1333_s24 = scalar_lea.vmem %s1085_s2, 32  ;;  %p1338_p6 = scmp.lt.s32.totalorder %s1085_s2, %s1085_s2 }
 0x6cc   :  { %p1334_p5 = scmp.ne.s32.totalorder %s1085_s2, %s1333_s24  ;;  %p1339_p7 = scmp.lt.s32.totalorder %s1333_s24, %s1333_s24 }
 0x6ce   :  { %p1340_p8 = por %p1339_p7, %p1338_p6 }
 0x6d0   :  { %p1341_p9 = pnand %p1340_p8, %p1334_p5 }
 0x786   :  { %v1073_v44 = vpop.f32.mrf.mxu1 }
 0x787   :  { %v1074_v45 = vadd.f32 %v1122_v2, %v1073_v44 }
 0x788   :  { %v1299_v52 = vpop.f32.mrf.mxu1 }
 0x789   :  { %1077 = vst [vmem:[#allocation3] sm:$0x3] %v1074_v45 }
 0x78a   :  { %1344 = shalt.err (!%p1341_p9)
}
 0x78b   :  { %1087 = dma.vmem_to_hbm [thread:$0]  %s1085_s2, 32, %s1786_s14, [#allocation4]  }
 0x78c   :  { %1353 = dma.done.wait [#allocation4], 32  }
 0x78d   :  { %1354 = vsyncadd [#allocation4], 4294967264 }
 0x78e   :  { %1355 = dma.done.wait [#allocation6], 32  }
 0x78f   :  { %1356 = vsyncadd [#allocation6], 4294967264 }
 0x790   :  { %1104 = vsyncpa [#allocation4], 1 }
 0x791   :  { %1105 = vsyncpa [#allocation6], 1 }

</bundles_post_ra>
